<compile_context>
chip_gen: v6e
topology: v6e:2x2x1
jax: 0.10.0
libtpu: 0.0.40
codegen_flags: <defaults>
</compile_context>

<pallas_src>
import jax
import jax.numpy as jnp
from jax.experimental import pallas as pl
from jax.experimental.pallas import tpu as pltpu


def _round_up(x, m):
    return ((x + m - 1) // m) * m


def actor_kernel(s_ref, w1_ref, b1_ref, w2_ref, b2_ref, w3_ref, b3_ref,
                 wls_ref, bls_ref, mean_ref, logstd_ref):
    x = s_ref[...]                                                    # (TB, S)

    # Layer 1 + ReLU
    h1 = jnp.dot(x, w1_ref[...], preferred_element_type=jnp.float32) + b1_ref[...]
    h1 = jnp.maximum(h1, 0.0)                                         # (TB, H)

    # Layer 2 + ReLU (shared trunk for both heads, as in the torch module)
    h2 = jnp.dot(h1, w2_ref[...], preferred_element_type=jnp.float32) + b2_ref[...]
    h2 = jnp.maximum(h2, 0.0)                                         # (TB, H)

    # Mean head: 2 * tanh(L3(h2))           (tanh -> EUP, free slot)
    zm = jnp.dot(h2, w3_ref[...], preferred_element_type=jnp.float32) + b3_ref[...]
    mean_ref[...] = jnp.tanh(zm) * 2.0                                # (TB, A)

    # log_std head: clamp(Lls(h2), -20, 0)  (clip -> VPU)
    zl = jnp.dot(h2, wls_ref[...], preferred_element_type=jnp.float32) + bls_ref[...]
    logstd_ref[...] = jnp.clip(zl, -20.0, 0.0)                        # (TB, A)


def _choose_batch_tile(batch, max_block_b):
    """Batch tile: as large as practical (amortize per-step overhead), but keep
    >=2 tiles when batch > 8 so v7x megacore sharding has work for both TCs."""
    if batch <= 8:
        return batch                      # single block equal to full batch dim
    tb = _round_up(pl.cdiv(batch, 2), 8)  # two tiles, each a multiple of 8
    tb = min(tb, max_block_b)
    return max(tb, 8)


def actor_forward(state, params, *, max_block_b=2048):
    (w1, b1, w2, b2, w3, b3, wls, bls) = params
    B, S = state.shape
    A = w3.shape[1]

    tb = _choose_batch_tile(B, max_block_b)
    grid = (pl.cdiv(B, tb),)

    # Weights/biases: full-array blocks, constant index_map -> VMEM-resident
    # across the batch grid (a single DMA for the whole call).
    def resident(arr):
        nd = arr.ndim
        return pl.BlockSpec(arr.shape, lambda i, _nd=nd: (0,) * _nd)

    mean, log_std = pl.pallas_call(
        actor_kernel,
        out_shape=(
            jax.ShapeDtypeStruct((B, A), jnp.float32),
            jax.ShapeDtypeStruct((B, A), jnp.float32),
        ),
        grid=grid,
        in_specs=[
            pl.BlockSpec((tb, S), lambda i: (i, 0)),   # state, blocked over batch
            resident(w1), resident(b1),
            resident(w2), resident(b2),
            resident(w3), resident(b3),
            resident(wls), resident(bls),
        ],
        out_specs=[
            pl.BlockSpec((tb, A), lambda i: (i, 0)),   # mean
            pl.BlockSpec((tb, A), lambda i: (i, 0)),   # log_std
        ],
        compiler_params=pltpu.CompilerParams(
            dimension_semantics=("parallel",),          # v7x 2-TC batch sharding
        ),
    )(state, w1, b1, w2, b2, w3, b3, wls, bls)

    return mean, log_std


def init_params(key, state_dim, action_dim, hidden_dim):
    """Deterministic synthetic init mirroring the module's shapes.

    Weights are stored transposed: (in_features, out_features).
    Last-layer weights/biases use the uniform ranges from __init__.
    """
    ks = jax.random.split(key, 8)
    u = lambda k, shape, lo, hi: jax.random.uniform(
        k, shape, dtype=jnp.float32, minval=lo, maxval=hi)

    w1 = u(ks[0], (state_dim, hidden_dim), -0.3, 0.3)
    b1 = u(ks[1], (1, hidden_dim), -0.3, 0.3)
    w2 = u(ks[2], (hidden_dim, hidden_dim), -0.2, 0.2)
    b2 = u(ks[3], (1, hidden_dim), -0.2, 0.2)
    w3 = u(ks[4], (hidden_dim, action_dim), -0.1, 0.1)   # actor_net[-2].weight
    b3 = u(ks[5], (1, action_dim), -0.1, 0.1)            # actor_net[-2].bias
    wls = u(ks[6], (hidden_dim, action_dim), -0.1, 0.1)  # log_std.weight
    bls = u(ks[7], (1, action_dim), -1.0, -0.5)          # log_std.bias
    return (w1, b1, w2, b2, w3, b3, wls, bls)


def actor_forward_ref(state, params):
    """Pure-JAX reference for correctness check."""
    (w1, b1, w2, b2, w3, b3, wls, bls) = params
    h1 = jnp.maximum(state @ w1 + b1, 0.0)
    h2 = jnp.maximum(h1 @ w2 + b2, 0.0)
    mean = jnp.tanh(h2 @ w3 + b3) * 2.0
    log_std = jnp.clip(h2 @ wls + bls, -20.0, 0.0)
    return mean, log_std


if __name__ == "__main__":
    key = jax.random.PRNGKey(0)
    k_params, k_state = jax.random.split(key)

    # Module-default hidden width; small state/action dims; batch big enough to
    # exercise a 2-tile batch grid (128-row tiles).
    batch, state_dim, action_dim, hidden_dim = 256, 8, 4, 128
    params = init_params(k_params, state_dim, action_dim, hidden_dim)
    state = jax.random.normal(k_state, (batch, state_dim), dtype=jnp.float32)

    mean, log_std = actor_forward(state, params)
    jax.block_until_ready((mean, log_std))

    mean_ref, log_std_ref = actor_forward_ref(state, params)
    assert mean.shape == (batch, action_dim)
    assert log_std.shape == (batch, action_dim)
    assert jnp.allclose(mean, mean_ref, atol=1e-5, rtol=1e-5)
    assert jnp.allclose(log_std, log_std_ref, atol=1e-5, rtol=1e-5)

    # Single-tile path (tiny batch, tb == B).
    small_state = state[:4]
    m2, ls2 = actor_forward(small_state, params)
    jax.block_until_ready((m2, ls2))
    m2_ref, ls2_ref = actor_forward_ref(small_state, params)
    assert jnp.allclose(m2, m2_ref, atol=1e-5, rtol=1e-5)
    assert jnp.allclose(ls2, ls2_ref, atol=1e-5, rtol=1e-5)

    # Ragged batch (partial last tile, masked writeback path).
    ragged_state = state[:100]
    m3, ls3 = actor_forward(ragged_state, params)
    jax.block_until_ready((m3, ls3))
    m3_ref, ls3_ref = actor_forward_ref(ragged_state, params)
    assert jnp.allclose(m3, m3_ref, atol=1e-5, rtol=1e-5)
    assert jnp.allclose(ls3, ls3_ref, atol=1e-5, rtol=1e-5)

    print("KERNEL_OK")
</pallas_src>

<mosaic_0001>
module attributes {stable_mosaic.version = 11 : i64} {
  func.func @actor_kernel(%arg0: i32, %arg1: memref<128x8xf32, #tpu.memory_space<vmem>>, %arg2: memref<8x128xf32, #tpu.memory_space<vmem>>, %arg3: memref<1x128xf32, #tpu.memory_space<vmem>>, %arg4: memref<128x128xf32, #tpu.memory_space<vmem>>, %arg5: memref<1x128xf32, #tpu.memory_space<vmem>>, %arg6: memref<128x4xf32, #tpu.memory_space<vmem>>, %arg7: memref<1x4xf32, #tpu.memory_space<vmem>>, %arg8: memref<128x4xf32, #tpu.memory_space<vmem>>, %arg9: memref<1x4xf32, #tpu.memory_space<vmem>>, %arg10: memref<128x4xf32, #tpu.memory_space<vmem>>, %arg11: memref<128x4xf32, #tpu.memory_space<vmem>>) attributes {dimension_semantics = [#tpu.dimension_semantics<parallel>], iteration_bounds = array<i64: 2>, scalar_prefetch = 0 : i64, scratch_operands = 0 : i64, tpu.core_type = #tpu.core_type<tc>, window_params = [{transform_indices = @transform_0, window_bounds = array<i64: 128, 8>}, {pipeline_mode = #tpu.pipeline_mode<synchronous>, transform_indices = @transform_1, window_bounds = array<i64: 8, 128>}, {pipeline_mode = #tpu.pipeline_mode<synchronous>, transform_indices = @transform_2, window_bounds = array<i64: 1, 128>}, {pipeline_mode = #tpu.pipeline_mode<synchronous>, transform_indices = @transform_3, window_bounds = array<i64: 128, 128>}, {pipeline_mode = #tpu.pipeline_mode<synchronous>, transform_indices = @transform_4, window_bounds = array<i64: 1, 128>}, {pipeline_mode = #tpu.pipeline_mode<synchronous>, transform_indices = @transform_5, window_bounds = array<i64: 128, 4>}, {pipeline_mode = #tpu.pipeline_mode<synchronous>, transform_indices = @transform_6, window_bounds = array<i64: 1, 4>}, {pipeline_mode = #tpu.pipeline_mode<synchronous>, transform_indices = @transform_7, window_bounds = array<i64: 128, 4>}, {pipeline_mode = #tpu.pipeline_mode<synchronous>, transform_indices = @transform_8, window_bounds = array<i64: 1, 4>}, {transform_indices = @transform_9, window_bounds = array<i64: 128, 4>}, {transform_indices = @transform_10, window_bounds = array<i64: 128, 4>}]} {
    %c0 = arith.constant 0 : index
    %c0_0 = arith.constant 0 : index
    %0 = vector.load %arg1[%c0, %c0_0] : memref<128x8xf32, #tpu.memory_space<vmem>>, vector<128x8xf32>
    %c0_1 = arith.constant 0 : index
    %c0_2 = arith.constant 0 : index
    %1 = vector.load %arg2[%c0_1, %c0_2] : memref<8x128xf32, #tpu.memory_space<vmem>>, vector<8x128xf32>
    %cst = arith.constant dense<0.000000e+00> : vector<128x128xf32>
    %2 = tpu.matmul %0, %1, %cst {dimension_numbers = #tpu.dot_dimension_numbers<[1], [0], [0], [1], [0, 0, 1, 1], [], []>} : vector<128x8xf32>, vector<8x128xf32>, vector<128x128xf32> -> vector<128x128xf32>
    %c0_3 = arith.constant 0 : index
    %c0_4 = arith.constant 0 : index
    %3 = vector.load %arg3[%c0_3, %c0_4] : memref<1x128xf32, #tpu.memory_space<vmem>>, vector<1x128xf32>
    %4 = vector.broadcast %3 : vector<1x128xf32> to vector<128x128xf32>
    %5 = arith.addf %2, %4 : vector<128x128xf32>
    %cst_5 = arith.constant 0.000000e+00 : f32
    %6 = vector.broadcast %cst_5 : f32 to vector<128x128xf32>
    %7 = arith.maximumf %5, %6 : vector<128x128xf32>
    %c0_6 = arith.constant 0 : index
    %c0_7 = arith.constant 0 : index
    %8 = vector.load %arg4[%c0_6, %c0_7] : memref<128x128xf32, #tpu.memory_space<vmem>>, vector<128x128xf32>
    %cst_8 = arith.constant dense<0.000000e+00> : vector<128x128xf32>
    %9 = tpu.matmul %7, %8, %cst_8 {dimension_numbers = #tpu.dot_dimension_numbers<[1], [0], [0], [1], [0, 0, 1, 1], [], []>} : vector<128x128xf32>, vector<128x128xf32>, vector<128x128xf32> -> vector<128x128xf32>
    %c0_9 = arith.constant 0 : index
    %c0_10 = arith.constant 0 : index
    %10 = vector.load %arg5[%c0_9, %c0_10] : memref<1x128xf32, #tpu.memory_space<vmem>>, vector<1x128xf32>
    %11 = vector.broadcast %10 : vector<1x128xf32> to vector<128x128xf32>
    %12 = arith.addf %9, %11 : vector<128x128xf32>
    %cst_11 = arith.constant 0.000000e+00 : f32
    %13 = vector.broadcast %cst_11 : f32 to vector<128x128xf32>
    %14 = arith.maximumf %12, %13 : vector<128x128xf32>
    %c0_12 = arith.constant 0 : index
    %c0_13 = arith.constant 0 : index
    %15 = vector.load %arg6[%c0_12, %c0_13] : memref<128x4xf32, #tpu.memory_space<vmem>>, vector<128x4xf32>
    %cst_14 = arith.constant dense<0.000000e+00> : vector<128x4xf32>
    %16 = tpu.matmul %14, %15, %cst_14 {dimension_numbers = #tpu.dot_dimension_numbers<[1], [0], [0], [1], [0, 0, 1, 1], [], []>} : vector<128x128xf32>, vector<128x4xf32>, vector<128x4xf32> -> vector<128x4xf32>
    %c0_15 = arith.constant 0 : index
    %c0_16 = arith.constant 0 : index
    %17 = vector.load %arg7[%c0_15, %c0_16] : memref<1x4xf32, #tpu.memory_space<vmem>>, vector<1x4xf32>
    %18 = vector.broadcast %17 : vector<1x4xf32> to vector<128x4xf32>
    %19 = arith.addf %16, %18 : vector<128x4xf32>
    %20 = math.tanh %19 : vector<128x4xf32>
    %cst_17 = arith.constant 2.000000e+00 : f32
    %21 = vector.broadcast %cst_17 : f32 to vector<128x4xf32>
    %22 = arith.mulf %20, %21 : vector<128x4xf32>
    %c0_18 = arith.constant 0 : index
    %c0_19 = arith.constant 0 : index
    %23 = vector.load %arg10[%c0_18, %c0_19] : memref<128x4xf32, #tpu.memory_space<vmem>>, vector<128x4xf32>
    tpu.vector_store %arg10[%c0_18, %c0_19], %22 {strides = array<i32>} : memref<128x4xf32, #tpu.memory_space<vmem>>, vector<128x4xf32>,
    %c0_20 = arith.constant 0 : index
    %c0_21 = arith.constant 0 : index
    %24 = vector.load %arg8[%c0_20, %c0_21] : memref<128x4xf32, #tpu.memory_space<vmem>>, vector<128x4xf32>
    %cst_22 = arith.constant dense<0.000000e+00> : vector<128x4xf32>
    %25 = tpu.matmul %14, %24, %cst_22 {dimension_numbers = #tpu.dot_dimension_numbers<[1], [0], [0], [1], [0, 0, 1, 1], [], []>} : vector<128x128xf32>, vector<128x4xf32>, vector<128x4xf32> -> vector<128x4xf32>
    %c0_23 = arith.constant 0 : index
    %c0_24 = arith.constant 0 : index
    %26 = vector.load %arg9[%c0_23, %c0_24] : memref<1x4xf32, #tpu.memory_space<vmem>>, vector<1x4xf32>
    %27 = vector.broadcast %26 : vector<1x4xf32> to vector<128x4xf32>
    %28 = arith.addf %25, %27 : vector<128x4xf32>
    %cst_25 = arith.constant -2.000000e+01 : f32
    %cst_26 = arith.constant 0.000000e+00 : f32
    %29 = vector.broadcast %cst_25 : f32 to vector<128x4xf32>
    %30 = arith.maximumf %29, %28 : vector<128x4xf32>
    %31 = vector.broadcast %cst_26 : f32 to vector<128x4xf32>
    %32 = arith.minimumf %31, %30 : vector<128x4xf32>
    %c0_27 = arith.constant 0 : index
    %c0_28 = arith.constant 0 : index
    %33 = vector.load %arg11[%c0_27, %c0_28] : memref<128x4xf32, #tpu.memory_space<vmem>>, vector<128x4xf32>
    tpu.vector_store %arg11[%c0_27, %c0_28], %32 {strides = array<i32>} : memref<128x4xf32, #tpu.memory_space<vmem>>, vector<128x4xf32>,
    return
  }
  func.func @transform_0(%arg0: i32) -> (i32, i32) {
    %c0_i32 = arith.constant 0 : i32
    %c0_i32_0 = arith.constant 0 : i32
    return %arg0, %c0_i32 : i32, i32
  }
  func.func @transform_1(%arg0: i32) -> (i32, i32) {
    %c0_i32 = arith.constant 0 : i32
    %c0_i32_0 = arith.constant 0 : i32
    %c0_i32_1 = arith.constant 0 : i32
    return %c0_i32, %c0_i32_0 : i32, i32
  }
  func.func @transform_2(%arg0: i32) -> (i32, i32) {
    %c0_i32 = arith.constant 0 : i32
    %c0_i32_0 = arith.constant 0 : i32
    %c0_i32_1 = arith.constant 0 : i32
    return %c0_i32, %c0_i32_0 : i32, i32
  }
  func.func @transform_3(%arg0: i32) -> (i32, i32) {
    %c0_i32 = arith.constant 0 : i32
    %c0_i32_0 = arith.constant 0 : i32
    %c0_i32_1 = arith.constant 0 : i32
    return %c0_i32, %c0_i32_0 : i32, i32
  }
  func.func @transform_4(%arg0: i32) -> (i32, i32) {
    %c0_i32 = arith.constant 0 : i32
    %c0_i32_0 = arith.constant 0 : i32
    %c0_i32_1 = arith.constant 0 : i32
    return %c0_i32, %c0_i32_0 : i32, i32
  }
  func.func @transform_5(%arg0: i32) -> (i32, i32) {
    %c0_i32 = arith.constant 0 : i32
    %c0_i32_0 = arith.constant 0 : i32
    %c0_i32_1 = arith.constant 0 : i32
    return %c0_i32, %c0_i32_0 : i32, i32
  }
  func.func @transform_6(%arg0: i32) -> (i32, i32) {
    %c0_i32 = arith.constant 0 : i32
    %c0_i32_0 = arith.constant 0 : i32
    %c0_i32_1 = arith.constant 0 : i32
    return %c0_i32, %c0_i32_0 : i32, i32
  }
  func.func @transform_7(%arg0: i32) -> (i32, i32) {
    %c0_i32 = arith.constant 0 : i32
    %c0_i32_0 = arith.constant 0 : i32
    %c0_i32_1 = arith.constant 0 : i32
    return %c0_i32, %c0_i32_0 : i32, i32
  }
  func.func @transform_8(%arg0: i32) -> (i32, i32) {
    %c0_i32 = arith.constant 0 : i32
    %c0_i32_0 = arith.constant 0 : i32
    %c0_i32_1 = arith.constant 0 : i32
    return %c0_i32, %c0_i32_0 : i32, i32
  }
  func.func @transform_9(%arg0: i32) -> (i32, i32) {
    %c0_i32 = arith.constant 0 : i32
    %c0_i32_0 = arith.constant 0 : i32
    return %arg0, %c0_i32 : i32, i32
  }
  func.func @transform_10(%arg0: i32) -> (i32, i32) {
    %c0_i32 = arith.constant 0 : i32
    %c0_i32_0 = arith.constant 0 : i32
    return %arg0, %c0_i32 : i32, i32
  }
}

</mosaic_0001>

<bundles_post_ra>
// kernel: tpu_custom_call.1
= control target key start
LH: loop header
LB: loop body
LE: loop exit
PB: predicated region body
PF: predicated region fallthrough
CT: control target
= control target key end

     0   :  { %s1793_s13 = smov 0   ;;  %s2289_s0 = inlined_call_operand.vmem [shape: f32[256,8], index: 0, kind: input, shape index: {}]   ;;  %s2290_s1 = inlined_call_operand.vmem [shape: f32[8,128], index: 1, kind: input, shape index: {}]   ;;  %s2291_s2 = inlined_call_operand.vmem [shape: f32[1,128], index: 2, kind: input, shape index: {}]   ;;  %s2292_s3 = inlined_call_operand.vmem [shape: f32[128,128], index: 3, kind: input, shape index: {}]   ;;  %s2293_s4 = inlined_call_operand.vmem [shape: f32[1,128], index: 4, kind: input, shape index: {}]   ;;  %s2294_s5 = inlined_call_operand.vmem [shape: f32[128,4], index: 5, kind: input, shape index: {}]   ;;  %s2295_s6 = inlined_call_operand.vmem [shape: f32[1,4], index: 6, kind: input, shape index: {}]   ;;  %s2296_s7 = inlined_call_operand.vmem [shape: f32[128,4], index: 7, kind: input, shape index: {}]   ;;  %s2297_s8 = inlined_call_operand.vmem [shape: f32[1,4], index: 8, kind: input, shape index: {}]   ;;  %s2298_s9 = inlined_call_operand.vmem [shape: f32[256,4], index: 9, kind: output, shape index: {0}]   ;;  %s2299_s10 = inlined_call_operand.vmem [shape: f32[256,4], index: 10, kind: output, shape index: {1}]  }
   0x1 LB: > { %s1318_s14 = sadd.s32 4294967295, %s1736_s13   ;;  %p1322_p0 = scmp.ge.s32.totalorder %s1736_s13, 1  ;;  %s1736_s13 = sphi %s1793_s13, %s21_s13  }
   0x2   : > { %p316_p1 = scmp.lt.s32.totalorder %s1736_s13, 3 }
   0x4   : > { %p317_p2 = pnand %p1322_p0, %p316_p1 }
   0x5   : > { %s1323_s17 = sshll.u32 (!%p317_p2), %s1318_s14, 4 }
   0x6   : > { %320 = sbr.rel (%p317_p2) target bundleno = 659 (0x293), region = 56  ;;  %p360_p3 = scmp.lt.s32.totalorder (!%p317_p2), %s1323_s17, 31 }
   0xb   : > { %v393_v0 = vld [vmem:[%s2290_s1] sm:$0xff]  ;;  %v626_v1 = vld [vmem:[%s2292_s3 + $0x78] sm:$0xff]  ;;  %v625_v2 = vld [vmem:[%s2292_s3 + $0x70] sm:$0xff]  ;;  %s2301_s17 = smov (!%p360_p3, %s1323_s17), 31  ;;  %vm401_vm0 = vcmask 64512   ;;  %vm995_vm1 = vcmask 31744  }
   0xc   : > { %1464 = vmatprep.subr.mxu0 %v393_v0  ;;  %1490 = vmatprep.subr.mxu1 %v626_v1  ;;  %v624_v3 = vld [vmem:[%s2292_s3 + $0x68] sm:$0xff]  ;;  %v623_v4 = vld [vmem:[%s2292_s3 + $0x60] sm:$0xff]  ;;  %s1816_s26 = sshll.u32 %s2301_s17, 3  ;;  %v622_v5 = vld [vmem:[%s2292_s3 + $0x58] sm:$0xff] }
   0xd   : > { %1465 = vmatpush3.msra.mxu0 %v393_v0  ;;  %1491 = vmatpush3.msra.mxu1 %v626_v1  ;;  %s1822_s29 = scalar_lea.vmem %s2289_s0, %s1816_s26  ;;  %v621_v9 = vld [vmem:[%s2292_s3 + $0x50] sm:$0xff]  ;;  %v620_v11 = vld [vmem:[%s2292_s3 + $0x48] sm:$0xff]  ;;  %v619_v13 = vld [vmem:[%s2292_s3 + $0x40] sm:$0xff]  ;;  %s2190_s19 = scalar_lea.vmem %s2298_s9, %s1816_s26 }
   0xe   : > { %1492 = vmatprep.subr.mxu1 %v625_v2  ;;  %v377_v6 = vld [vmem:[%s1822_s29] sm:$0xff]  ;;  %v378_v7 = vld [vmem:[%s1822_s29 + $0x8] sm:$0xff]  ;;  %v379_v8 = vld [vmem:[%s1822_s29 + $0x10] sm:$0xff]  ;;  %s2198_s22 = scalar_lea.vmem %s2299_s10, %s1816_s26 }
   0xf   : > { %1493 = vmatpush3.msra.mxu1 %v625_v2  ;;  %1466 = vmatprep.mubr.msk.f32.mxu0 %vm401_vm0, %v377_v6  ;;  %v380_v10 = vld [vmem:[%s1822_s29 + $0x18] sm:$0xff]  ;;  %v381_v12 = vld [vmem:[%s1822_s29 + $0x20] sm:$0xff]  ;;  %v382_v14 = vld [vmem:[%s1822_s29 + $0x28] sm:$0xff] }
  0x10   : > { %1494 = vmatprep.subr.mxu1 %v624_v3  ;;  %1467 = vmatmul.mubr.msk.f32.vlgmr.msra.gmra.mxu0 %vm401_vm0, %v378_v7  ;;  %v618_v15 = vld [vmem:[%s2292_s3 + $0x38] sm:$0xff]  ;;  %v383_v16 = vld [vmem:[%s1822_s29 + $0x30] sm:$0xff]  ;;  %v616_v19 = vld [vmem:[%s2292_s3 + $0x28] sm:$0xff] }
  0x11   : > { %1495 = vmatpush3.msra.mxu1 %v624_v3  ;;  %1469 = vmatprep.mubr.msk.f32.mxu0 %vm401_vm0, %v379_v8  ;;  %v617_v17 = vld [vmem:[%s2292_s3 + $0x30] sm:$0xff]  ;;  %v384_v18 = vld [vmem:[%s1822_s29 + $0x38] sm:$0xff]  ;;  %v385_v20 = vld [vmem:[%s1822_s29 + $0x40] sm:$0xff] }
  0x12   : > { %1496 = vmatprep.subr.mxu1 %v623_v4  ;;  %v615_v21 = vld [vmem:[%s2292_s3 + $0x20] sm:$0xff]  ;;  %v386_v22 = vld [vmem:[%s1822_s29 + $0x48] sm:$0xff]  ;;  %v387_v23 = vld [vmem:[%s1822_s29 + $0x50] sm:$0xff] }
  0x13   : > { %1497 = vmatpush3.msra.mxu1 %v623_v4  ;;  %v388_v24 = vld [vmem:[%s1822_s29 + $0x58] sm:$0xff]  ;;  %v389_v25 = vld [vmem:[%s1822_s29 + $0x60] sm:$0xff]  ;;  %v390_v26 = vld [vmem:[%s1822_s29 + $0x68] sm:$0xff] }
  0x14   : > { %1498 = vmatprep.subr.mxu1 %v622_v5  ;;  %1470 = vmatmul.mubr.msk.f32.gmra.mxu0 %vm401_vm0, %v380_v10  ;;  %v391_v27 = vld [vmem:[%s1822_s29 + $0x70] sm:$0xff]  ;;  %v392_v28 = vld [vmem:[%s1822_s29 + $0x78] sm:$0xff]  ;;  %v612_v31 = vld [vmem:[%s2292_s3 + $0x8] sm:$0xff] }
  0x15   : > { %1499 = vmatpush3.msra.mxu1 %v622_v5  ;;  %1472 = vmatprep.mubr.msk.f32.mxu0 %vm401_vm0, %v381_v12  ;;  %v614_v29 = vld [vmem:[%s2292_s3 + $0x18] sm:$0xff]  ;;  %v613_v30 = vld [vmem:[%s2292_s3 + $0x10] sm:$0xff]  ;;  %v611_v32 = vld [vmem:[%s2292_s3] sm:$0xff] }
  0x16   : > { %1500 = vmatprep.subr.mxu1 %v621_v9  ;;  %v810_v33 = vld [vmem:[%s2294_s5 + $0x78] sm:$0xff]  ;;  %v809_v34 = vld [vmem:[%s2294_s5 + $0x70] sm:$0xff]  ;;  %v808_v35 = vld [vmem:[%s2294_s5 + $0x68] sm:$0xff] }
  0x17   : > { %1501 = vmatpush3.msra.mxu1 %v621_v9  ;;  %1546 = vmatprep.subr.mxu0 %v810_v33  ;;  %v1904_v36 = vld [vmem:[%s2296_s7 + $0x78] sm:$0xff]  ;;  %v807_v37 = vld [vmem:[%s2294_s5 + $0x60] sm:$0xff]  ;;  %v805_v39 = vld [vmem:[%s2294_s5 + $0x50] sm:$0xff] }
  0x18   : > { %1502 = vmatprep.subr.mxu1 %v620_v11  ;;  %1473 = vmatmul.mubr.msk.f32.gmra.mxu0 %vm401_vm0, %v382_v14  ;;  %v806_v38 = vld [vmem:[%s2294_s5 + $0x58] sm:$0xff]  ;;  %v804_v40 = vld [vmem:[%s2294_s5 + $0x48] sm:$0xff]  ;;  %v803_v41 = vld [vmem:[%s2294_s5 + $0x40] sm:$0xff] }
  0x19   : > { %1503 = vmatpush3.msra.mxu1 %v620_v11  ;;  %1475 = vmatprep.mubr.msk.f32.mxu0 %vm401_vm0, %v383_v16  ;;  %v802_v42 = vld [vmem:[%s2294_s5 + $0x38] sm:$0xff]  ;;  %v801_v43 = vld [vmem:[%s2294_s5 + $0x30] sm:$0xff]  ;;  %v800_v44 = vld [vmem:[%s2294_s5 + $0x28] sm:$0xff] }
  0x1a   : > { %1504 = vmatprep.subr.mxu1 %v619_v13  ;;  %1547 = vmatpush3.msra.mxu0 %v810_v33  ;;  %v799_v45 = vld [vmem:[%s2294_s5 + $0x20] sm:$0xff]  ;;  %v798_v46 = vld [vmem:[%s2294_s5 + $0x18] sm:$0xff]  ;;  %v1949_v58 = vld [vmem:[%s2296_s7 + $0x70] sm:$0xff] }
  0x1b   : > { %1505 = vmatpush3.msra.mxu1 %v619_v13  ;;  %1548 = vmatprep.subr.mxu0 %v809_v34  ;;  %v1940_v47 = vld [vmem:[%s2291_s2] ss:$0 sm:$0xff]  ;;  %v1955_v61 = vld [vmem:[%s2296_s7 + $0x68] sm:$0xff]  ;;  %v1971_v5 = vld [vmem:[%s2296_s7 + $0x58] sm:$0xff] }
  0x1c   : > { %1506 = vmatprep.subr.mxu1 %v618_v15  ;;  %1476 = vmatmul.mubr.msk.f32.gmra.mxu0 %vm401_vm0, %v384_v18  ;;  %v1964_v2 = vld [vmem:[%s2296_s7 + $0x60] sm:$0xff]  ;;  %v1980_v10 = vld [vmem:[%s2296_s7 + $0x50] sm:$0xff] }
  0x1d   : > { %1507 = vmatpush3.msra.mxu1 %v618_v15  ;;  %1478 = vmatprep.mubr.msk.f32.mxu0 %vm401_vm0, %v385_v20 }
  0x1e   : > { %1508 = vmatprep.subr.mxu1 %v617_v17  ;;  %1549 = vmatpush3.msra.mxu0 %v809_v34 }
  0x1f   : > { %1509 = vmatpush3.msra.mxu1 %v617_v17  ;;  %1550 = vmatprep.subr.mxu0 %v808_v35 }
  0x20   : > { %1510 = vmatprep.subr.mxu1 %v616_v19  ;;  %1479 = vmatmul.mubr.msk.f32.gmra.mxu0 %vm401_vm0, %v386_v22 }
  0x21   : > { %1511 = vmatpush3.msra.mxu1 %v616_v19  ;;  %1481 = vmatprep.mubr.msk.f32.mxu0 %vm401_vm0, %v387_v23 }
  0x22   : > { %1512 = vmatprep.subr.mxu1 %v615_v21  ;;  %1551 = vmatpush3.msra.mxu0 %v808_v35 }
  0x23   : > { %1513 = vmatpush3.msra.mxu1 %v615_v21  ;;  %1552 = vmatprep.subr.mxu0 %v807_v37 }
  0x24   : > { %1482 = vmatmul.mubr.msk.f32.gmra.mxu0 %vm401_vm0, %v388_v24  ;;  %1514 = vmatprep.subr.mxu1 %v614_v29 }
  0x25   : > { %1484 = vmatprep.mubr.msk.f32.mxu0 %vm401_vm0, %v389_v25  ;;  %1515 = vmatpush3.msra.mxu1 %v614_v29 }
  0x26   : > { %1516 = vmatprep.subr.mxu1 %v613_v30  ;;  %1553 = vmatpush3.msra.mxu0 %v807_v37 }
  0x27   : > { %1517 = vmatpush3.msra.mxu1 %v613_v30  ;;  %1554 = vmatprep.subr.mxu0 %v806_v38 }
  0x28   : > { %1485 = vmatmul.mubr.msk.f32.gmra.mxu0 %vm401_vm0, %v390_v26  ;;  %1518 = vmatprep.subr.mxu1 %v612_v31 }
  0x29   : > { %1487 = vmatprep.mubr.msk.f32.mxu0 %vm401_vm0, %v391_v27  ;;  %1519 = vmatpush3.msra.mxu1 %v612_v31 }
  0x2a   : > { %1520 = vmatprep.subr.mxu1 %v611_v32  ;;  %1555 = vmatpush3.msra.mxu0 %v806_v38  ;;  %v1997_v38 = vld [vmem:[%s2296_s7 + $0x48] sm:$0xff] }
  0x2b   : > { %1521 = vmatpush3.msra.mxu1 %v611_v32  ;;  %1556 = vmatprep.subr.mxu0 %v805_v39 }
  0x2c   : > { %1488 = vmatmul.mubr.msk.f32.gmra.mxu0 %vm401_vm0, %v392_v28  ;;  %1658 = vmatprep.subr.mxu1 %v1904_v36 }
  0x2d   : > { %1557 = vmatpush3.msra.mxu0 %v805_v39  ;;  %v797_v39 = vld [vmem:[%s2294_s5 + $0x10] sm:$0xff] }
  0x2e   : > { %1558 = vmatprep.subr.mxu0 %v804_v40 }
  0x2f   : > { %1559 = vmatpush3.msra.mxu0 %v804_v40  ;;  %v2007_v40 = vld [vmem:[%s2296_s7 + $0x40] sm:$0xff] }
  0x30   : > { %1560 = vmatprep.subr.mxu0 %v803_v41 }
  0x31   : > { %1561 = vmatpush3.msra.mxu0 %v803_v41  ;;  %v796_v41 = vld [vmem:[%s2294_s5 + $0x8] sm:$0xff] }
  0x32   : > { %1562 = vmatprep.subr.mxu0 %v802_v42 }
  0x33   : > { %1563 = vmatpush3.msra.mxu0 %v802_v42  ;;  %v2017_v42 = vld [vmem:[%s2296_s7 + $0x38] sm:$0xff] }
  0x34   : > { %1564 = vmatprep.subr.mxu0 %v801_v43 }
  0x35   : > { %1565 = vmatpush3.msra.mxu0 %v801_v43  ;;  %v795_v43 = vld [vmem:[%s2294_s5] sm:$0xff] }
  0x36   : > { %1566 = vmatprep.subr.mxu0 %v800_v44 }
  0x37   : > { %1567 = vmatpush3.msra.mxu0 %v800_v44  ;;  %v2027_v44 = vld [vmem:[%s2296_s7 + $0x30] sm:$0xff] }
  0x38   : > { %1568 = vmatprep.subr.mxu0 %v799_v45 }
  0x39   : > { %1569 = vmatpush3.msra.mxu0 %v799_v45  ;;  %v2034_v45 = vld [vmem:[%s2296_s7 + $0x28] sm:$0xff] }
  0x3a   : > { %1570 = vmatprep.subr.mxu0 %v798_v46 }
  0x3b   : > { %1571 = vmatpush3.msra.mxu0 %v798_v46  ;;  %v2042_v46 = vld [vmem:[%s2296_s7 + $0x20] sm:$0xff] }
  0x3c   : > { %1572 = vmatprep.subr.mxu0 %v797_v39 }
  0x3d   : > { %1573 = vmatpush3.msra.mxu0 %v797_v39 }
  0x3e   : > { %1574 = vmatprep.subr.mxu0 %v796_v41 }
  0x3f   : > { %1575 = vmatpush3.msra.mxu0 %v796_v41 }
  0x40   : > { %1576 = vmatprep.subr.mxu0 %v795_v43 }
  0x41   : > { %1577 = vmatpush3.msra.mxu0 %v795_v43 }
  0x42   : > { %1602 = vmatprep.subr.mxu0 %v1904_v36 }
  0xd0   : > { %v1468_v48 = vpop.f32.mrf.mxu0 }
  0xd1   : > { %v522_v49 = vadd.f32 %v1468_v48, %v1940_v47  ;;  %v2056_v48 = vld [vmem:[%s2296_s7 + $0x10] sm:$0xff] }
  0xd2   : > { %v516_v50 = vpop.f32.mrf.mxu0 }
  0xd3   : > { %v517_v51 = vadd.f32 %v1940_v47, %v516_v50  ;;  %v596_v54 = vmax.f32 %v522_v49, 0.0  ;;  %v2063_v49 = vld [vmem:[%s2296_s7 + $0x8] sm:$0xff]  ;;  %v2070_v50 = vld [vmem:[%s2296_s7] sm:$0xff] }
  0xd4   : > { %v1471_v52 = vpop.f32.mrf.mxu0 }
  0xd5   : > { %v595_v53 = vmax.f32 %v517_v51, 0.0  ;;  %v532_v55 = vadd.f32 %v1471_v52, %v1940_v47  ;;  %v2077_v51 = vld [vmem:[%s2293_s4] ss:$0 sm:$0xff] }
  0xd6   : > { %v526_v56 = vpop.f32.mrf.mxu0 }
  0xd7   : > { %v527_v57 = vadd.f32 %v1940_v47, %v526_v56  ;;  %1522 = vmatprep.mubr.f32.mxu1 %v595_v53  ;;  %v598_v62 = vmax.f32 %v532_v55, 0.0 }
  0xd8   : > { %v1474_v59 = vpop.f32.mrf.mxu0  ;;  %1523 = vmatmul.mubr.f32.vlgmr.msra.gmra.mxu1 %v596_v54 }
  0xd9   : > { %v597_v60 = vmax.f32 %v527_v57, 0.0  ;;  %1674 = vmatpush3.msra.mxu1 %v1904_v36  ;;  %v542_v63 = vadd.f32 %v1474_v59, %v1940_v47 }
  0xda   : > { %v536_v0 = vpop.f32.mrf.mxu0  ;;  %1659 = vmatprep.subr.mxu1 %v1949_v58 }
  0xdb   : > { %v537_v1 = vadd.f32 %v1940_v47, %v536_v0  ;;  %1525 = vmatprep.mubr.f32.mxu1 %v597_v60  ;;  %1675 = vmatpush3.msra.mxu1 %v1949_v58  ;;  %v600_v6 = vmax.f32 %v542_v63, 0.0 }
  0xdc   : > { %v1477_v3 = vpop.f32.mrf.mxu0  ;;  %1526 = vmatmul.mubr.f32.gmra.mxu1 %v598_v62  ;;  %1660 = vmatprep.subr.mxu1 %v1955_v61 }
  0xdd   : > { %v599_v4 = vmax.f32 %v537_v1, 0.0  ;;  %1676 = vmatpush3.msra.mxu1 %v1955_v61  ;;  %v552_v7 = vadd.f32 %v1477_v3, %v1940_v47 }
  0xde   : > { %v546_v8 = vpop.f32.mrf.mxu0  ;;  %1661 = vmatprep.subr.mxu1 %v1964_v2 }
  0xdf   : > { %v547_v9 = vadd.f32 %v1940_v47, %v546_v8  ;;  %1528 = vmatprep.mubr.f32.mxu1 %v599_v4  ;;  %1677 = vmatpush3.msra.mxu1 %v1964_v2  ;;  %v602_v13 = vmax.f32 %v552_v7, 0.0 }
  0xe0   : > { %v1480_v11 = vpop.f32.mrf.mxu0  ;;  %1529 = vmatmul.mubr.f32.gmra.mxu1 %v600_v6  ;;  %1662 = vmatprep.subr.mxu1 %v1971_v5 }
  0xe1   : > { %v601_v12 = vmax.f32 %v547_v9, 0.0  ;;  %1678 = vmatpush3.msra.mxu1 %v1971_v5  ;;  %v562_v14 = vadd.f32 %v1480_v11, %v1940_v47 }
  0xe2   : > { %v556_v15 = vpop.f32.mrf.mxu0  ;;  %1663 = vmatprep.subr.mxu1 %v1980_v10 }
  0xe3   : > { %v557_v16 = vadd.f32 %v1940_v47, %v556_v15  ;;  %1531 = vmatprep.mubr.f32.mxu1 %v601_v12  ;;  %1679 = vmatpush3.msra.mxu1 %v1980_v10  ;;  %v604_v19 = vmax.f32 %v562_v14, 0.0 }
  0xe4   : > { %v1483_v17 = vpop.f32.mrf.mxu0  ;;  %1532 = vmatmul.mubr.f32.gmra.mxu1 %v602_v13  ;;  %1664 = vmatprep.subr.mxu1 %v1997_v38 }
  0xe5   : > { %v603_v18 = vmax.f32 %v557_v16, 0.0  ;;  %v572_v20 = vadd.f32 %v1483_v17, %v1940_v47  ;;  %1680 = vmatpush3.msra.mxu1 %v1997_v38 }
  0xe6   : > { %v566_v21 = vpop.f32.mrf.mxu0  ;;  %1665 = vmatprep.subr.mxu1 %v2007_v40 }
  0xe7   : > { %v567_v22 = vadd.f32 %v1940_v47, %v566_v21  ;;  %1534 = vmatprep.mubr.f32.mxu1 %v603_v18  ;;  %v606_v25 = vmax.f32 %v572_v20, 0.0  ;;  %1681 = vmatpush3.msra.mxu1 %v2007_v40 }
  0xe8   : > { %v1486_v23 = vpop.f32.mrf.mxu0  ;;  %1535 = vmatmul.mubr.f32.gmra.mxu1 %v604_v19  ;;  %1666 = vmatprep.subr.mxu1 %v2017_v42 }
  0xe9   : > { %v605_v24 = vmax.f32 %v567_v22, 0.0  ;;  %v582_v26 = vadd.f32 %v1486_v23, %v1940_v47  ;;  %1682 = vmatpush3.msra.mxu1 %v2017_v42 }
  0xea   : > { %v576_v27 = vpop.f32.mrf.mxu0  ;;  %1667 = vmatprep.subr.mxu1 %v2027_v44 }
  0xeb   : > { %v577_v28 = vadd.f32 %v1940_v47, %v576_v27  ;;  %1537 = vmatprep.mubr.f32.mxu1 %v605_v24  ;;  %v608_v31 = vmax.f32 %v582_v26, 0.0  ;;  %1683 = vmatpush3.msra.mxu1 %v2027_v44 }
  0xec   : > { %v1489_v29 = vpop.f32.mrf.mxu0  ;;  %1538 = vmatmul.mubr.f32.gmra.mxu1 %v606_v25  ;;  %1668 = vmatprep.subr.mxu1 %v2034_v45 }
  0xed   : > { %v607_v30 = vmax.f32 %v577_v28, 0.0  ;;  %v592_v32 = vadd.f32 %v1489_v29, %v1940_v47  ;;  %1684 = vmatpush3.msra.mxu1 %v2034_v45 }
  0xee   : > { %v586_v33 = vpop.f32.mrf.mxu0  ;;  %1669 = vmatprep.subr.mxu1 %v2042_v46 }
  0xef   : > { %v587_v34 = vadd.f32 %v1940_v47, %v586_v33  ;;  %1540 = vmatprep.mubr.f32.mxu1 %v607_v30  ;;  %v610_v37 = vmax.f32 %v592_v32, 0.0  ;;  %1685 = vmatpush3.msra.mxu1 %v2042_v46  ;;  %v2049_v47 = vld [vmem:[%s2296_s7 + $0x18] sm:$0xff] }
  0xf0   : > { %1541 = vmatmul.mubr.f32.gmra.mxu1 %v608_v31  ;;  %1670 = vmatprep.subr.mxu1 %v2049_v47 }
  0xf1   : > { %v609_v35 = vmax.f32 %v587_v34, 0.0  ;;  %1686 = vmatpush3.msra.mxu1 %v2049_v47 }
  0xf2   : > { %1671 = vmatprep.subr.mxu1 %v2056_v48 }
  0xf3   : > { %1543 = vmatprep.mubr.f32.mxu1 %v609_v35  ;;  %1687 = vmatpush3.msra.mxu1 %v2056_v48  ;;  %v2171_v35 = vld [vmem:[%s2295_s6] ss:$0 sm:$0xff] }
  0xf4   : > { %1544 = vmatmul.mubr.f32.gmra.mxu1 %v610_v37  ;;  %1672 = vmatprep.subr.mxu1 %v2063_v49 }
  0xf5   : > { %1688 = vmatpush3.msra.mxu1 %v2063_v49 }
  0xf6   : > { %1673 = vmatprep.subr.mxu1 %v2070_v50 }
  0xf7   : > { %1689 = vmatpush3.msra.mxu1 %v2070_v50 }
 0x198   : > { %v1524_v52 = vpop.f32.mrf.mxu1 }
 0x199   : > { %v2080_v53 = vadd.f32 %v1524_v52, %v2077_v51 }
 0x19a   : > { %v700_v54 = vpop.f32.mrf.mxu1 }
 0x19b   : > { %v2083_v55 = vadd.f32 %v2077_v51, %v700_v54  ;;  %v780_v59 = vmax.f32 %v2080_v53, 0.0 }
 0x19c   : > { %v1527_v56 = vpop.f32.mrf.mxu1 }
 0x19d   : > { %v779_v57 = vmax.f32 %v2083_v55, 0.0  ;;  %v2088_v60 = vadd.f32 %v1527_v56, %v2077_v51 }
 0x19e   : > { %v710_v62 = vpop.f32.mrf.mxu1 }
 0x19f   : > { %v2091_v63 = vadd.f32 %v2077_v51, %v710_v62  ;;  %1578 = vmatprep.mubr.f32.mxu0 %v779_v57  ;;  %v782_v3 = vmax.f32 %v2088_v60, 0.0 }
 0x1a0   : > { %v1530_v0 = vpop.f32.mrf.mxu1  ;;  %1579 = vmatmul.mubr.f32.vlgmr.msra.gmra.mxu0 %v780_v59 }
 0x1a1   : > { %v781_v1 = vmax.f32 %v2091_v63, 0.0  ;;  %1603 = vmatpush3.msra.mxu0 %v1904_v36  ;;  %v2101_v4 = vadd.f32 %v1530_v0, %v2077_v51 }
 0x1a2   : > { %1604 = vmatprep.subr.mxu0 %v1949_v58  ;;  %v720_v6 = vpop.f32.mrf.mxu1 }
 0x1a3   : > { %v2105_v7 = vadd.f32 %v2077_v51, %v720_v6  ;;  %1605 = vmatpush3.msra.mxu0 %v1949_v58  ;;  %1581 = vmatprep.mubr.f32.mxu0 %v781_v1  ;;  %v784_v9 = vmax.f32 %v2101_v4, 0.0 }
 0x1a4   : > { %1606 = vmatprep.subr.mxu0 %v1955_v61  ;;  %v1533_v8 = vpop.f32.mrf.mxu1  ;;  %1582 = vmatmul.mubr.f32.gmra.mxu0 %v782_v3 }
 0x1a5   : > { %v783_v36 = vmax.f32 %v2105_v7, 0.0  ;;  %1607 = vmatpush3.msra.mxu0 %v1955_v61  ;;  %v736_v58 = vadd.f32 %v1533_v8, %v2077_v51 }
 0x1a6   : > { %1608 = vmatprep.subr.mxu0 %v1964_v2  ;;  %v730_v11 = vpop.f32.mrf.mxu1 }
 0x1a7   : > { %v731_v12 = vadd.f32 %v2077_v51, %v730_v11  ;;  %1609 = vmatpush3.msra.mxu0 %v1964_v2  ;;  %1584 = vmatprep.mubr.f32.mxu0 %v783_v36  ;;  %v786_v15 = vmax.f32 %v736_v58, 0.0 }
 0x1a8   : > { %1610 = vmatprep.subr.mxu0 %v1971_v5  ;;  %v1536_v13 = vpop.f32.mrf.mxu1  ;;  %1585 = vmatmul.mubr.f32.gmra.mxu0 %v784_v9 }
 0x1a9   : > { %v785_v61 = vmax.f32 %v731_v12, 0.0  ;;  %1611 = vmatpush3.msra.mxu0 %v1971_v5  ;;  %v746_v16 = vadd.f32 %v1536_v13, %v2077_v51 }
 0x1aa   : > { %1612 = vmatprep.subr.mxu0 %v1980_v10  ;;  %v740_v14 = vpop.f32.mrf.mxu1 }
 0x1ab   : > { %v741_v2 = vadd.f32 %v2077_v51, %v740_v14  ;;  %1613 = vmatpush3.msra.mxu0 %v1980_v10  ;;  %1587 = vmatprep.mubr.f32.mxu0 %v785_v61  ;;  %v788_v19 = vmax.f32 %v746_v16, 0.0 }
 0x1ac   : > { %1614 = vmatprep.subr.mxu0 %v1997_v38  ;;  %1643 = vmatprep.mubr.f32.mxu1 %v785_v61  ;;  %v1539_v17 = vpop.f32.mrf.mxu1 }
 0x1ad   : > { %v787_v18 = vmax.f32 %v741_v2, 0.0  ;;  %1588 = vmatmul.mubr.f32.gmra.mxu0 %v786_v15  ;;  %1644 = vmatmul.mubr.f32.vlgmr.msra.gmra.mxu1 %v786_v15  ;;  %v756_v20 = vadd.f32 %v1539_v17, %v2077_v51 }
 0x1ae   : > { %1615 = vmatpush3.msra.mxu0 %v1997_v38  ;;  %v750_v5 = vpop.f32.mrf.mxu1 }
 0x1af   : > { %1616 = vmatprep.subr.mxu0 %v2007_v40  ;;  %v751_v21 = vadd.f32 %v2077_v51, %v750_v5  ;;  %1590 = vmatprep.mubr.f32.mxu0 %v787_v18  ;;  %v790_v24 = vmax.f32 %v756_v20, 0.0 }
 0x1b0   : > { %1617 = vmatpush3.msra.mxu0 %v2007_v40  ;;  %1646 = vmatprep.mubr.f32.mxu1 %v787_v18  ;;  %v1542_v10 = vpop.f32.mrf.mxu1 }
 0x1b1   : > { %v789_v22 = vmax.f32 %v751_v21, 0.0  ;;  %1618 = vmatprep.subr.mxu0 %v2017_v42  ;;  %1591 = vmatmul.mubr.f32.gmra.mxu0 %v788_v19  ;;  %v766_v25 = vadd.f32 %v1542_v10, %v2077_v51 }
 0x1b2   : > { %1619 = vmatpush3.msra.mxu0 %v2017_v42  ;;  %1647 = vmatmul.mubr.f32.gmra.mxu1 %v788_v19  ;;  %v760_v23 = vpop.f32.mrf.mxu1 }
 0x1b3   : > { %1620 = vmatprep.subr.mxu0 %v2027_v44  ;;  %v761_v26 = vadd.f32 %v2077_v51, %v760_v23  ;;  %1593 = vmatprep.mubr.f32.mxu0 %v789_v22  ;;  %v792_v30 = vmax.f32 %v766_v25, 0.0 }
 0x1b4   : > { %1621 = vmatpush3.msra.mxu0 %v2027_v44  ;;  %1649 = vmatprep.mubr.f32.mxu1 %v789_v22  ;;  %v1545_v27 = vpop.f32.mrf.mxu1 }
 0x1b5   : > { %v791_v28 = vmax.f32 %v761_v26, 0.0  ;;  %1622 = vmatprep.subr.mxu0 %v2034_v45  ;;  %1594 = vmatmul.mubr.f32.gmra.mxu0 %v790_v24  ;;  %v776_v31 = vadd.f32 %v1545_v27, %v2077_v51 }
 0x1b6   : > { %1623 = vmatpush3.msra.mxu0 %v2034_v45  ;;  %1650 = vmatmul.mubr.f32.gmra.mxu1 %v790_v24  ;;  %v770_v29 = vpop.f32.mrf.mxu1 }
 0x1b7   : > { %1624 = vmatprep.subr.mxu0 %v2042_v46  ;;  %v771_v32 = vadd.f32 %v2077_v51, %v770_v29  ;;  %1596 = vmatprep.mubr.f32.mxu0 %v791_v28  ;;  %v794_v34 = vmax.f32 %v776_v31, 0.0 }
 0x1b8   : > { %1625 = vmatpush3.msra.mxu0 %v2042_v46  ;;  %1652 = vmatprep.mubr.f32.mxu1 %v791_v28 }
 0x1b9   : > { %v793_v33 = vmax.f32 %v771_v32, 0.0  ;;  %1626 = vmatprep.subr.mxu0 %v2049_v47  ;;  %1597 = vmatmul.mubr.f32.gmra.mxu0 %v792_v30 }
 0x1ba   : > { %1627 = vmatpush3.msra.mxu0 %v2049_v47  ;;  %1653 = vmatmul.mubr.f32.gmra.mxu1 %v792_v30 }
 0x1bb   : > { %1628 = vmatprep.subr.mxu0 %v2056_v48  ;;  %1599 = vmatprep.mubr.f32.mxu0 %v793_v33 }
 0x1bc   : > { %1629 = vmatpush3.msra.mxu0 %v2056_v48  ;;  %1655 = vmatprep.mubr.f32.mxu1 %v793_v33 }
 0x1bd   : > { %1630 = vmatprep.subr.mxu0 %v2063_v49  ;;  %1600 = vmatmul.mubr.f32.gmra.mxu0 %v794_v34 }
 0x1be   : > { %1631 = vmatpush3.msra.mxu0 %v2063_v49  ;;  %1656 = vmatmul.mubr.f32.gmra.mxu1 %v794_v34  ;;  %v2182_v49 = vld [vmem:[%s2297_s8] ss:$0 sm:$0xff] }
 0x1bf   : > { %1632 = vmatprep.subr.mxu0 %v2070_v50  ;;  %1634 = vmatprep.mubr.f32.mxu0 %v779_v57 }
 0x1c0   : > { %1633 = vmatpush3.msra.mxu0 %v2070_v50 }
 0x1c1   : > { %1635 = vmatmul.mubr.f32.vlgmr.msra.gmra.mxu0 %v780_v59 }
 0x1c2   : > { %1637 = vmatprep.mubr.f32.mxu0 %v781_v1 }
 0x1c5   : > { %1638 = vmatmul.mubr.f32.gmra.mxu0 %v782_v3 }
 0x1c6   : > { %1640 = vmatprep.mubr.f32.mxu0 %v783_v36 }
 0x1c9   : > { %1641 = vmatmul.mubr.f32.gmra.mxu0 %v784_v9 }
 0x260   : > { %v1580_v37 = vpop.f32.mrf.mxu0 }
 0x261   : > { %v890_v38 = vadd.f32 %v1580_v37, %v2171_v35 }
 0x262   : > { %v884_v39 = vpop.f32.mrf.mxu0 }
 0x263   : > { %1698 = vtanh.f32 %v890_v38  ;;  %v885_v40 = vadd.f32 %v2171_v35, %v884_v39 }
 0x264   : > { %v1583_v41 = vpop.f32.mrf.mxu0 }
 0x265   : > { %1700 = vtanh.f32 %v885_v40  ;;  %v900_v42 = vadd.f32 %v1583_v41, %v2171_v35 }
 0x266   : > { %v894_v43 = vpop.f32.mrf.mxu0 }
 0x267   : > { %1702 = vtanh.f32 %v900_v42  ;;  %v895_v44 = vadd.f32 %v2171_v35, %v894_v43 }
 0x268   : > { %v1586_v45 = vpop.f32.mrf.mxu0 }
 0x269   : > { %1704 = vtanh.f32 %v895_v44  ;;  %v910_v46 = vadd.f32 %v1586_v45, %v2171_v35 }
 0x26a   : > { %v904_v47 = vpop.f32.mrf.mxu0 }
 0x26b   : > { %1706 = vtanh.f32 %v910_v46  ;;  %v905_v48 = vadd.f32 %v2171_v35, %v904_v47 }
 0x26d   : > { %1708 = vtanh.f32 %v905_v48  ;;  %v1589_v50 = vpop.f32.mrf.mxu0  ;;  %v1645_v51 = vpop.f32.mrf.mxu1 }
 0x26e   : > { %v920_v52 = vadd.f32 %v1589_v50, %v2171_v35  ;;  %v1137_v53 = vadd.f32 %v1645_v51, %v2182_v49 }
 0x26f   : > { %v914_v54 = vpop.f32.mrf.mxu0  ;;  %v1131_v55 = vpop.f32.mrf.mxu1 }
 0x270   : > { %v1699_v56 = vpop.eup %1698  ;;  %1710 = vtanh.f32 %v920_v52  ;;  %v1187_v57 = vmax.f32 %v1137_v53, -20.0  ;;  %v915_v59 = vadd.f32 %v2171_v35, %v914_v54  ;;  %v1132_v60 = vadd.f32 %v2182_v49, %v1131_v55 }
 0x271   : > { %v980_v62 = vmul.f32 2.0, %v1699_v56  ;;  %v1592_v63 = vpop.f32.mrf.mxu0 }
 0x272   : > { %v1701_v0 = vpop.eup %1700  ;;  %v1203_v1 = vmin.f32 %v1187_v57, 0.0  ;;  %1712 = vtanh.f32 %v915_v59  ;;  %v1186_v3 = vmax.f32 %v1132_v60, -20.0  ;;  %v930_v4 = vadd.f32 %v1592_v63, %v2171_v35  ;;  %v1648_v6 = vpop.f32.mrf.mxu1 }
 0x273   : > { %997 = vst.msk [vmem:[%s2190_s19 + $0x8] sm:$0xff] %vm995_vm1, %v980_v62  ;;  %v979_v7 = vmul.f32 2.0, %v1701_v0  ;;  %v1147_v8 = vadd.f32 %v1648_v6, %v2182_v49  ;;  %v924_v36 = vpop.f32.mrf.mxu0 }
 0x274   : > { %v1703_v9 = vpop.eup %1702  ;;  %1219 = vst.msk [vmem:[%s2198_s22 + $0x38] sm:$0xff] %vm995_vm1, %v1203_v1  ;;  %v1202_v11 = vmin.f32 %v1186_v3, 0.0  ;;  %1714 = vtanh.f32 %v930_v4  ;;  %v925_v58 = vadd.f32 %v2171_v35, %v924_v36  ;;  %v1141_v12 = vpop.f32.mrf.mxu1 }
 0x275   : > { %996 = vst.msk [vmem:[%s2190_s19] sm:$0xff] %vm995_vm1, %v979_v7  ;;  %v982_v13 = vmul.f32 2.0, %v1703_v9  ;;  %v1189_v61 = vmax.f32 %v1147_v8, -20.0  ;;  %v1142_v14 = vadd.f32 %v2182_v49, %v1141_v12  ;;  %v1595_v15 = vpop.f32.mrf.mxu0 }
 0x276   : > { %v1705_v16 = vpop.eup %1704  ;;  %1218 = vst.msk [vmem:[%s2198_s22 + $0x30] sm:$0xff] %vm995_vm1, %v1202_v11  ;;  %1716 = vtanh.f32 %v925_v58  ;;  %v940_v2 = vadd.f32 %v1595_v15, %v2171_v35  ;;  %v1651_v17 = vpop.f32.mrf.mxu1 }
 0x277   : > { %999 = vst.msk [vmem:[%s2190_s19 + $0x18] sm:$0xff] %vm995_vm1, %v982_v13  ;;  %v981_v18 = vmul.f32 2.0, %v1705_v16  ;;  %v1205_v5 = vmin.f32 %v1189_v61, 0.0  ;;  %v1188_v19 = vmax.f32 %v1142_v14, -20.0  ;;  %v1157_v20 = vadd.f32 %v1651_v17, %v2182_v49  ;;  %v934_v21 = vpop.f32.mrf.mxu0 }
 0x278   : > { %v1707_v10 = vpop.eup %1706  ;;  %1718 = vtanh.f32 %v940_v2  ;;  %v935_v22 = vadd.f32 %v2171_v35, %v934_v21  ;;  %v1151_v23 = vpop.f32.mrf.mxu1 }
 0x279   : > { %998 = vst.msk [vmem:[%s2190_s19 + $0x10] sm:$0xff] %vm995_vm1, %v981_v18  ;;  %v984_v24 = vmul.f32 2.0, %v1707_v10  ;;  %1221 = vst.msk [vmem:[%s2198_s22 + $0x48] sm:$0xff] %vm995_vm1, %v1205_v5  ;;  %v1204_v25 = vmin.f32 %v1188_v19, 0.0  ;;  %v1191_v26 = vmax.f32 %v1157_v20, -20.0  ;;  %v1152_v27 = vadd.f32 %v2182_v49, %v1151_v23  ;;  %v1598_v28 = vpop.f32.mrf.mxu0 }
 0x27a   : > { %v1709_v29 = vpop.eup %1708  ;;  %1720 = vtanh.f32 %v935_v22  ;;  %v950_v30 = vadd.f32 %v1598_v28, %v2171_v35  ;;  %v1654_v31 = vpop.f32.mrf.mxu1 }
 0x27b   : > { %1001 = vst.msk [vmem:[%s2190_s19 + $0x28] sm:$0xff] %vm995_vm1, %v984_v24  ;;  %v983_v32 = vmul.f32 2.0, %v1709_v29  ;;  %1220 = vst.msk [vmem:[%s2198_s22 + $0x40] sm:$0xff] %vm995_vm1, %v1204_v25  ;;  %v1207_v33 = vmin.f32 %v1191_v26, 0.0  ;;  %v1190_v34 = vmax.f32 %v1152_v27, -20.0  ;;  %v1167_v37 = vadd.f32 %v1654_v31, %v2182_v49  ;;  %v944_v38 = vpop.f32.mrf.mxu0 }
 0x27c   : > { %1722 = vtanh.f32 %v950_v30  ;;  %v945_v39 = vadd.f32 %v2171_v35, %v944_v38  ;;  %v1161_v40 = vpop.f32.mrf.mxu1 }
 0x27d   : > { %v1711_v41 = vpop.eup %1710  ;;  %1000 = vst.msk [vmem:[%s2190_s19 + $0x20] sm:$0xff] %vm995_vm1, %v983_v32  ;;  %1223 = vst.msk [vmem:[%s2198_s22 + $0x58] sm:$0xff] %vm995_vm1, %v1207_v33  ;;  %v1206_v42 = vmin.f32 %v1190_v34, 0.0  ;;  %v1193_v43 = vmax.f32 %v1167_v37, -20.0  ;;  %v1162_v44 = vadd.f32 %v2182_v49, %v1161_v40  ;;  %v1601_v45 = vpop.f32.mrf.mxu0 }
 0x27e   : > { %v986_v46 = vmul.f32 2.0, %v1711_v41  ;;  %1724 = vtanh.f32 %v945_v39  ;;  %v960_v47 = vadd.f32 %v1601_v45, %v2171_v35  ;;  %v1657_v48 = vpop.f32.mrf.mxu1 }
 0x27f   : > { %v1713_v50 = vpop.eup %1712  ;;  %1222 = vst.msk [vmem:[%s2198_s22 + $0x50] sm:$0xff] %vm995_vm1, %v1206_v42  ;;  %v1209_v51 = vmin.f32 %v1193_v43, 0.0  ;;  %v1192_v52 = vmax.f32 %v1162_v44, -20.0  ;;  %v1177_v53 = vadd.f32 %v1657_v48, %v2182_v49  ;;  %v954_v54 = vpop.f32.mrf.mxu0 }
 0x280   : > { %1003 = vst.msk [vmem:[%s2190_s19 + $0x38] sm:$0xff] %vm995_vm1, %v986_v46  ;;  %v985_v55 = vmul.f32 2.0, %v1713_v50  ;;  %1726 = vtanh.f32 %v960_v47  ;;  %v955_v56 = vadd.f32 %v2171_v35, %v954_v54  ;;  %v1171_v57 = vpop.f32.mrf.mxu1 }
 0x281   : > { %v1715_v59 = vpop.eup %1714  ;;  %1225 = vst.msk [vmem:[%s2198_s22 + $0x68] sm:$0xff] %vm995_vm1, %v1209_v51  ;;  %v1208_v60 = vmin.f32 %v1192_v52, 0.0  ;;  %v1195_v62 = vmax.f32 %v1177_v53, -20.0  ;;  %v1172_v63 = vadd.f32 %v2182_v49, %v1171_v57  ;;  %v1636_v0 = vpop.f32.mrf.mxu0 }
 0x282   : > { %1002 = vst.msk [vmem:[%s2190_s19 + $0x30] sm:$0xff] %vm995_vm1, %v985_v55  ;;  %v988_v1 = vmul.f32 2.0, %v1715_v59  ;;  %1728 = vtanh.f32 %v955_v56  ;;  %v1107_v3 = vadd.f32 %v1636_v0, %v2182_v49 }
 0x283   : > { %v1717_v4 = vpop.eup %1716  ;;  %1224 = vst.msk [vmem:[%s2198_s22 + $0x60] sm:$0xff] %vm995_vm1, %v1208_v60  ;;  %v1211_v35 = vmin.f32 %v1195_v62, 0.0  ;;  %v1194_v6 = vmax.f32 %v1172_v63, -20.0  ;;  %v1101_v7 = vpop.f32.mrf.mxu0 }
 0x284   : > { %1005 = vst.msk [vmem:[%s2190_s19 + $0x48] sm:$0xff] %vm995_vm1, %v988_v1  ;;  %v987_v8 = vmul.f32 2.0, %v1717_v4  ;;  %v1181_v36 = vmax.f32 %v1107_v3, -20.0  ;;  %v1102_v9 = vadd.f32 %v2182_v49, %v1101_v7 }
 0x285   : > { %v1719_v11 = vpop.eup %1718  ;;  %1227 = vst.msk [vmem:[%s2198_s22 + $0x78] sm:$0xff] %vm995_vm1, %v1211_v35  ;;  %v1210_v58 = vmin.f32 %v1194_v6, 0.0  ;;  %v1639_v12 = vpop.f32.mrf.mxu0 }
 0x286   : > { %1004 = vst.msk [vmem:[%s2190_s19 + $0x40] sm:$0xff] %vm995_vm1, %v987_v8  ;;  %v990_v13 = vmul.f32 2.0, %v1719_v11  ;;  %v1197_v61 = vmin.f32 %v1181_v36, 0.0  ;;  %v1180_v14 = vmax.f32 %v1102_v9, -20.0  ;;  %v1117_v15 = vadd.f32 %v1639_v12, %v2182_v49 }
 0x287   : > { %v1721_v16 = vpop.eup %1720  ;;  %1226 = vst.msk [vmem:[%s2198_s22 + $0x70] sm:$0xff] %vm995_vm1, %v1210_v58  ;;  %v1111_v2 = vpop.f32.mrf.mxu0 }
 0x288   : > { %1007 = vst.msk [vmem:[%s2190_s19 + $0x58] sm:$0xff] %vm995_vm1, %v990_v13  ;;  %v989_v17 = vmul.f32 2.0, %v1721_v16  ;;  %1213 = vst.msk [vmem:[%s2198_s22 + $0x8] sm:$0xff] %vm995_vm1, %v1197_v61  ;;  %v1196_v18 = vmin.f32 %v1180_v14, 0.0  ;;  %v1183_v5 = vmax.f32 %v1117_v15, -20.0  ;;  %v1112_v19 = vadd.f32 %v2182_v49, %v1111_v2 }
 0x289   : > { %v1723_v20 = vpop.eup %1722  ;;  %v1642_v21 = vpop.f32.mrf.mxu0 }
 0x28a   : > { %1006 = vst.msk [vmem:[%s2190_s19 + $0x50] sm:$0xff] %vm995_vm1, %v989_v17  ;;  %v992_v10 = vmul.f32 2.0, %v1723_v20  ;;  %1212 = vst.msk [vmem:[%s2198_s22] sm:$0xff] %vm995_vm1, %v1196_v18  ;;  %v1199_v22 = vmin.f32 %v1183_v5, 0.0  ;;  %v1182_v23 = vmax.f32 %v1112_v19, -20.0  ;;  %v1127_v24 = vadd.f32 %v1642_v21, %v2182_v49 }
 0x28b   : > { %v1725_v25 = vpop.eup %1724  ;;  %v1121_v26 = vpop.f32.mrf.mxu0 }
 0x28c   : > { %1009 = vst.msk [vmem:[%s2190_s19 + $0x68] sm:$0xff] %vm995_vm1, %v992_v10  ;;  %v991_v27 = vmul.f32 2.0, %v1725_v25  ;;  %1215 = vst.msk [vmem:[%s2198_s22 + $0x18] sm:$0xff] %vm995_vm1, %v1199_v22  ;;  %v1198_v28 = vmin.f32 %v1182_v23, 0.0  ;;  %v1185_v29 = vmax.f32 %v1127_v24, -20.0  ;;  %v1122_v30 = vadd.f32 %v2182_v49, %v1121_v26 }
 0x28d   : > { %v1727_v31 = vpop.eup %1726 }
 0x28e   : > { %1008 = vst.msk [vmem:[%s2190_s19 + $0x60] sm:$0xff] %vm995_vm1, %v991_v27  ;;  %v994_v32 = vmul.f32 2.0, %v1727_v31  ;;  %1214 = vst.msk [vmem:[%s2198_s22 + $0x10] sm:$0xff] %vm995_vm1, %v1198_v28  ;;  %v1201_v33 = vmin.f32 %v1185_v29, 0.0  ;;  %v1184_v34 = vmax.f32 %v1122_v30, -20.0 }
 0x28f   : > { %v1729_v37 = vpop.eup %1728 }
 0x290   : > { %1011 = vst.msk [vmem:[%s2190_s19 + $0x78] sm:$0xff] %vm995_vm1, %v994_v32  ;;  %v993_v38 = vmul.f32 2.0, %v1729_v37  ;;  %1217 = vst.msk [vmem:[%s2198_s22 + $0x28] sm:$0xff] %vm995_vm1, %v1201_v33  ;;  %v1200_v39 = vmin.f32 %v1184_v34, 0.0 }
 0x292   : > { %1010 = vst.msk [vmem:[%s2190_s19 + $0x70] sm:$0xff] %vm995_vm1, %v993_v38  ;;  %1216 = vst.msk [vmem:[%s2198_s22 + $0x20] sm:$0xff] %vm995_vm1, %v1200_v39 }
 0x293 PF: > { %s21_s13 = sadd.s32 1, %s1736_s13  }
 0x294   : > { %p18_p4 = scmp.ge.s32.totalorder %s21_s13, 4  }
 0x296   :  { %20 = sbr.rel (!%p18_p4) target bundleno = 1 (0x1), region = 98 }

</bundles_post_ra>
